<compile_context>
chip_gen: v5e
topology: v5e:2x2
jax: 0.10.0
libtpu: 0.0.40
codegen_flags: <defaults>
</compile_context>

<pallas_src>
import jax
import jax.numpy as jnp
from jax.experimental import pallas as pl
from jax.experimental.pallas import tpu as pltpu


def _make_conv1x1_bn_relu_kernel(cin, use_mxu):
    """Build the fused kernel body. cin is static (trace-time unroll)."""
    if use_mxu:
        def kernel(x_ref, w_ref, bias_ref, o_ref):
            # x_ref: (1, Cin, THW), w_ref: (Cout, Cin), bias_ref: (Cout, 1)
            y = jnp.dot(w_ref[...].astype(jnp.float32),
                        x_ref[0].astype(jnp.float32),
                        preferred_element_type=jnp.float32)
            o_ref[0] = jnp.maximum(y + bias_ref[...], 0.0).astype(o_ref.dtype)
    else:
        def kernel(x_ref, w_ref, bias_ref, o_ref):
            # Unrolled VPU multiply-accumulate: avoids pushing an (8x4)@(4xTHW)
            # dot through a 128/256-wide MXU (<1% utilization + FIFO latency).
            x = x_ref[0].astype(jnp.float32)        # (Cin, THW)
            w = w_ref[...].astype(jnp.float32)      # (Cout, Cin)
            acc = w[:, 0:1] * x[0:1, :]             # (Cout, THW)
            for i in range(1, cin):                 # static unroll over Cin
                acc = acc + w[:, i:i + 1] * x[i:i + 1, :]
            o_ref[0] = jnp.maximum(acc + bias_ref[...], 0.0).astype(o_ref.dtype)
    return kernel


def _round_up(v, m):
    return ((v + m - 1) // m) * m


def _pick_hw_tile(hw_pad, cin, cout, itemsize, batch,
                  tile_vmem_budget_bytes=16 * 1024 * 1024,
                  max_tile=65536):
    """Largest multiple-of-128 divisor of hw_pad within the VMEM budget.

    hw_pad is already a multiple of 128, so 128 is always a legal fallback.
    """
    # Double-buffered input + output bytes per HW element.
    per_elem = 2 * (cin + cout) * itemsize
    budget = max(128, (tile_vmem_budget_bytes // per_elem) // 128 * 128)
    budget = min(budget, max_tile)
    if batch == 1 and hw_pad >= 256:
        # Guarantee >= 2 grid steps so v7x megacore gets two shards.
        budget = min(budget, max(128, (hw_pad // 2) // 128 * 128))
    best = 128
    t = 128
    cap = min(hw_pad, budget)
    while t <= cap:
        if hw_pad % t == 0:
            best = t
        t += 128
    return best


def one_by_one_forward(x_nchw, w_oi, conv_bias, gamma, beta, run_mean, run_var,
                       eps=1e-5, io_dtype=jnp.float32):
    """Fused 1x1-conv + BatchNorm(eval) + ReLU, NCHW in / NCHW out.

    x_nchw   : (B, C_in, H, W)
    w_oi     : (C_out, C_in)   conv weight (kernel_size=1 squeezed)
    conv_bias: (C_out,)        conv bias (nn.Conv2d default bias=True)
    gamma, beta, run_mean, run_var: (C_out,) BatchNorm2d params / running stats
    io_dtype : streaming dtype for activations/weights (f32 default; bf16 OK
               if the surrounding model tolerates it — compute stays f32).
    """
    B, Cin, H, W = x_nchw.shape
    Cout = w_oi.shape[0]
    HW = H * W

    # Fold BN (inference mode) into the conv weight and a per-channel bias:
    #   relu((W x + b_conv - mean) * g/sqrt(var+eps) + beta)
    # = relu((W * scale[:,None]) x + (beta + (b_conv - mean) * scale))
    # TODO(synk): training-mode BN (batch statistics) would need a reduction
    # over the conv output; running stats (eval mode) are used here.
    scale = (gamma / jnp.sqrt(run_var + eps)).astype(jnp.float32)
    w_folded = (w_oi.astype(jnp.float32) * scale[:, None]).astype(io_dtype)
    bias2d = (beta + (conv_bias - run_mean) * scale).reshape(Cout, 1).astype(jnp.float32)

    # Free reshape: NCHW -> (B, Cin, H*W), HW on the lane axis.
    x3d = x_nchw.reshape(B, Cin, HW).astype(io_dtype)

    # Pad HW to a multiple of 128 so both loads and stores stay unmasked.
    hw_pad = _round_up(HW, 128)
    if hw_pad != HW:
        x3d = jnp.pad(x3d, ((0, 0), (0, 0), (0, hw_pad - HW)))

    itemsize = jnp.dtype(io_dtype).itemsize
    thw = _pick_hw_tile(hw_pad, Cin, Cout, itemsize, B)
    grid = (B, hw_pad // thw)

    use_mxu = (Cin >= 64) and (Cout >= 64)
    kernel = _make_conv1x1_bn_relu_kernel(Cin, use_mxu)

    # VMEM limit derived from the real double-buffered tile footprint + slack.
    tile_bytes = 2 * (Cin + Cout) * thw * itemsize
    vmem_limit = int(min(32 * 1024 * 1024,
                         max(8 * 1024 * 1024, tile_bytes * 3 // 2 + (2 << 20))))

    out3d = pl.pallas_call(
        kernel,
        out_shape=jax.ShapeDtypeStruct((B, Cout, hw_pad), io_dtype),
        grid_spec=pltpu.PrefetchScalarGridSpec(
            num_scalar_prefetch=0,
            grid=grid,
            in_specs=[
                pl.BlockSpec((1, Cin, thw), lambda b, j: (b, 0, j)),  # x tile
                pl.BlockSpec((Cout, Cin), lambda b, j: (0, 0)),       # weight
                pl.BlockSpec((Cout, 1), lambda b, j: (0, 0)),         # bias
            ],
            out_specs=pl.BlockSpec((1, Cout, thw), lambda b, j: (b, 0, j)),
        ),
        compiler_params=pltpu.CompilerParams(
            dimension_semantics=("parallel", "parallel"),
            vmem_limit_bytes=vmem_limit,
        ),
    )(x3d, w_folded, bias2d)

    # Drop HW padding (cheap slice) and reshape back to NCHW (free).
    return out3d[:, :, :HW].reshape(B, Cout, H, W)


def _reference(x_nchw, w_oi, conv_bias, gamma, beta, run_mean, run_var, eps=1e-5):
    # Pure-JAX reference of the same forward.
    y = jnp.einsum("bihw,oi->bohw", x_nchw, w_oi) + conv_bias[None, :, None, None]
    y = (y - run_mean[None, :, None, None]) / jnp.sqrt(run_var + eps)[None, :, None, None]
    y = y * gamma[None, :, None, None] + beta[None, :, None, None]
    return jnp.maximum(y, 0.0)


if __name__ == "__main__":
    B, Cin, Cout, H, W = 2, 4, 8, 16, 16

    key = jax.random.PRNGKey(0)
    kx, kw, kb, kg, kbe, km, kv = jax.random.split(key, 7)

    x = jax.random.normal(kx, (B, Cin, H, W), dtype=jnp.float32)
    w_oi = jax.random.normal(kw, (Cout, Cin), dtype=jnp.float32) * 0.1
    conv_bias = jax.random.normal(kb, (Cout,), dtype=jnp.float32) * 0.1
    gamma = 1.0 + 0.1 * jax.random.normal(kg, (Cout,), dtype=jnp.float32)
    beta = 0.1 * jax.random.normal(kbe, (Cout,), dtype=jnp.float32)
    run_mean = 0.1 * jax.random.normal(km, (Cout,), dtype=jnp.float32)
    run_var = 1.0 + 0.1 * jnp.abs(jax.random.normal(kv, (Cout,), dtype=jnp.float32))

    out = one_by_one_forward(x, w_oi, conv_bias, gamma, beta, run_mean, run_var)
    out = jax.block_until_ready(out)

    ref = _reference(x, w_oi, conv_bias, gamma, beta, run_mean, run_var)
    assert out.shape == (B, Cout, H, W)
    assert jnp.allclose(out, ref, atol=1e-5, rtol=1e-5), "mismatch vs reference"

    print("KERNEL_OK")
</pallas_src>

<mosaic_0001>
module attributes {stable_mosaic.version = 11 : i64} {
  func.func @kernel(%arg0: i32, %arg1: i32, %arg2: memref<1x4x256xf32, #tpu.memory_space<vmem>>, %arg3: memref<8x4xf32, #tpu.memory_space<vmem>>, %arg4: memref<8x1xf32, #tpu.memory_space<vmem>>, %arg5: memref<1x8x256xf32, #tpu.memory_space<vmem>>) attributes {dimension_semantics = [#tpu.dimension_semantics<parallel>, #tpu.dimension_semantics<parallel>], iteration_bounds = array<i64: 2, 1>, scalar_prefetch = 0 : i64, scratch_operands = 0 : i64, tpu.core_type = #tpu.core_type<tc>, window_params = [{transform_indices = @transform_0, window_bounds = array<i64: 1, 4, 256>}, {pipeline_mode = #tpu.pipeline_mode<synchronous>, transform_indices = @transform_1, window_bounds = array<i64: 8, 4>}, {pipeline_mode = #tpu.pipeline_mode<synchronous>, transform_indices = @transform_2, window_bounds = array<i64: 8, 1>}, {transform_indices = @transform_3, window_bounds = array<i64: 1, 8, 256>}]} {
    %c0 = arith.constant 0 : index
    %c0_0 = arith.constant 0 : index
    %c0_1 = arith.constant 0 : index
    %0 = vector.load %arg2[%c0, %c0_0, %c0_1] : memref<1x4x256xf32, #tpu.memory_space<vmem>>, vector<1x4x256xf32>
    %1 = vector.shape_cast %0 : vector<1x4x256xf32> to vector<4x256xf32>
    %c0_2 = arith.constant 0 : index
    %c0_3 = arith.constant 0 : index
    %2 = vector.load %arg3[%c0_2, %c0_3] : memref<8x4xf32, #tpu.memory_space<vmem>>, vector<8x4xf32>
    %3 = vector.extract_strided_slice %2 {offsets = [0, 0], sizes = [8, 1], strides = [1, 1]} : vector<8x4xf32> to vector<8x1xf32>
    %4 = vector.extract_strided_slice %1 {offsets = [0, 0], sizes = [1, 256], strides = [1, 1]} : vector<4x256xf32> to vector<1x256xf32>
    %5 = vector.broadcast %3 : vector<8x1xf32> to vector<8x256xf32>
    %6 = vector.broadcast %4 : vector<1x256xf32> to vector<8x256xf32>
    %7 = arith.mulf %5, %6 : vector<8x256xf32>
    %8 = vector.extract_strided_slice %2 {offsets = [0, 1], sizes = [8, 1], strides = [1, 1]} : vector<8x4xf32> to vector<8x1xf32>
    %9 = vector.extract_strided_slice %1 {offsets = [1, 0], sizes = [1, 256], strides = [1, 1]} : vector<4x256xf32> to vector<1x256xf32>
    %10 = vector.broadcast %8 : vector<8x1xf32> to vector<8x256xf32>
    %11 = vector.broadcast %9 : vector<1x256xf32> to vector<8x256xf32>
    %12 = arith.mulf %10, %11 : vector<8x256xf32>
    %13 = arith.addf %7, %12 : vector<8x256xf32>
    %14 = vector.extract_strided_slice %2 {offsets = [0, 2], sizes = [8, 1], strides = [1, 1]} : vector<8x4xf32> to vector<8x1xf32>
    %15 = vector.extract_strided_slice %1 {offsets = [2, 0], sizes = [1, 256], strides = [1, 1]} : vector<4x256xf32> to vector<1x256xf32>
    %16 = vector.broadcast %14 : vector<8x1xf32> to vector<8x256xf32>
    %17 = vector.broadcast %15 : vector<1x256xf32> to vector<8x256xf32>
    %18 = arith.mulf %16, %17 : vector<8x256xf32>
    %19 = arith.addf %13, %18 : vector<8x256xf32>
    %20 = vector.extract_strided_slice %2 {offsets = [0, 3], sizes = [8, 1], strides = [1, 1]} : vector<8x4xf32> to vector<8x1xf32>
    %21 = vector.extract_strided_slice %1 {offsets = [3, 0], sizes = [1, 256], strides = [1, 1]} : vector<4x256xf32> to vector<1x256xf32>
    %22 = vector.broadcast %20 : vector<8x1xf32> to vector<8x256xf32>
    %23 = vector.broadcast %21 : vector<1x256xf32> to vector<8x256xf32>
    %24 = arith.mulf %22, %23 : vector<8x256xf32>
    %25 = arith.addf %19, %24 : vector<8x256xf32>
    %c0_4 = arith.constant 0 : index
    %c0_5 = arith.constant 0 : index
    %26 = vector.load %arg4[%c0_4, %c0_5] : memref<8x1xf32, #tpu.memory_space<vmem>>, vector<8x1xf32>
    %27 = vector.broadcast %26 : vector<8x1xf32> to vector<8x256xf32>
    %28 = arith.addf %25, %27 : vector<8x256xf32>
    %cst = arith.constant 0.000000e+00 : f32
    %29 = vector.broadcast %cst : f32 to vector<8x256xf32>
    %30 = arith.maximumf %28, %29 : vector<8x256xf32>
    %c0_6 = arith.constant 0 : index
    %c0_7 = arith.constant 0 : index
    %c0_8 = arith.constant 0 : index
    %31 = vector.load %arg5[%c0_6, %c0_7, %c0_8] : memref<1x8x256xf32, #tpu.memory_space<vmem>>, vector<1x8x256xf32>
    %32 = vector.shape_cast %31 : vector<1x8x256xf32> to vector<8x256xf32>
    %33 = vector.shape_cast %30 : vector<8x256xf32> to vector<1x8x256xf32>
    tpu.vector_store %arg5[%c0_6, %c0_7, %c0_8], %33 {strides = array<i32>} : memref<1x8x256xf32, #tpu.memory_space<vmem>>, vector<1x8x256xf32>,
    return
  }
  func.func @transform_0(%arg0: i32, %arg1: i32) -> (i32, i32, i32) {
    %c0_i32 = arith.constant 0 : i32
    %c0_i32_0 = arith.constant 0 : i32
    return %arg0, %c0_i32, %arg1 : i32, i32, i32
  }
  func.func @transform_1(%arg0: i32, %arg1: i32) -> (i32, i32) {
    %c0_i32 = arith.constant 0 : i32
    %c0_i32_0 = arith.constant 0 : i32
    %c0_i32_1 = arith.constant 0 : i32
    return %c0_i32, %c0_i32_0 : i32, i32
  }
  func.func @transform_2(%arg0: i32, %arg1: i32) -> (i32, i32) {
    %c0_i32 = arith.constant 0 : i32
    %c0_i32_0 = arith.constant 0 : i32
    %c0_i32_1 = arith.constant 0 : i32
    return %c0_i32, %c0_i32_0 : i32, i32
  }
  func.func @transform_3(%arg0: i32, %arg1: i32) -> (i32, i32, i32) {
    %c0_i32 = arith.constant 0 : i32
    %c0_i32_0 = arith.constant 0 : i32
    return %arg0, %c0_i32, %arg1 : i32, i32, i32
  }
}

</mosaic_0001>

<bundles_post_ra>
// kernel: tpu_custom_call.1
= control target key start
LH: loop header
LB: loop body
LE: loop exit
PB: predicated region body
PF: predicated region fallthrough
CT: control target
= control target key end

     0   :  { %8 = vsyncpa [#allocation3], 0  ;;  %s656_s0 = inlined_call_operand.vmem [shape: f32[2,4,256], index: 0, kind: input, shape index: {}]   ;;  %s657_s1 = inlined_call_operand.vmem [shape: f32[8,4], index: 1, kind: input, shape index: {}]   ;;  %s658_s2 = inlined_call_operand.vmem [shape: f32[8,1], index: 2, kind: input, shape index: {}]   ;;  %s659_s3 = inlined_call_operand.hbm [shape: f32[2,8,256], index: 3, kind: output, shape index: {}]  }
   0x1   :  { %10 = vsyncpa [#allocation3 + $0x1], 0  ;;  %s549_s12 = smov 0   ;;  %s551_s13 = smov 0  }
   0x2   :  { %s553_s14 = smov 0   ;;  %s555_s15 = smov 0  }
   0x3   :  { %s557_s16 = smov 0   ;;  %s559_s17 = smov 0  }
   0x4 LB: > { %s365_s18 = sadd.s32 4294967295, %s523_s17   ;;  %s366_s19 = sadd.s32 4294967294, %s523_s17   ;;  %s523_s17 = sphi %s559_s17, %s16_s17   ;;  %s519_s16 = sphi %s557_s16, %s666_s16   ;;  %s515_s15 = sphi %s555_s15, %s665_s15   ;;  %s511_s14 = sphi %s553_s14, %s664_s14   ;;  %s507_s13 = sphi %s551_s13, %s663_s13   ;;  %s503_s12 = sphi %s549_s12, %s662_s12  }
   0x5   : > { %s28_s20 = sadd.s32 1, %s519_s16  ;;  %s107_s21 = sadd.s32 1, %s511_s14 }
   0x6   : > { %p30_p0 = scmp.ge.s32.totalorder %s28_s20, 2  ;;  %p117_p1 = scmp.ne.s32.totalorder %s511_s14, %s507_s13 }
   0x7   : > { %p118_p2 = scmp.eq.s32.totalorder %s365_s18, 1  ;;  %p123_p3 = scmp.ne.s32.totalorder %s507_s13, %s503_s12 }
   0x8   : > { %s668_s20 = smov (%p30_p0, %s28_s20), 0  ;;  %p124_p5 = scmp.eq.s32.totalorder %s366_s19, 1 }
   0x9   : > { %p589_p4 = por %p118_p2, %p117_p1  ;;  %s102_s23 = ssub.s32 %s519_s16, %s668_s20 }
   0xa   : > { %p369_p6 = scmp.ge.s32.totalorder %s523_s17, 1  ;;  %p105_p7 = scmp.eq.s32.totalorder %s102_s23, 0 }
   0xb   : > { %p596_p8 = por %p124_p5, %p123_p3  ;;  %p161_p9 = scmp.lt.s32.totalorder %s523_s17, 3 }
   0xc   : > { %s602_s25 = scalar_select %p105_p7, %s511_s14, %s107_s21  }
   0xd   : > { %p162_p10 = pnand %p369_p6, %p161_p9 }
   0xe   : > { %p190_p11 = scmp.lt.s32.totalorder (!%p162_p10), %s515_s15, 1  ;;  %s186_s8 = sand.u32 (!%p162_p10), 1, %s507_s13  }
   0xf   : > { %165 = sbr.rel (%p162_p10) target bundleno = 162 (0xa2), region = 32  ;;  %s370_s9 = sshll.u32 (!%p162_p10), %s186_s8, 4 }
  0x10   : > { %s379_s10 = sshll.u32 (!%p162_p10), %s515_s15, 4  ;;  %s188_s21 = scalar_lea.vmem (!%p162_p10), [#allocation2], %s370_s9 }
  0x11   : > { %s284_s19 = scalar_lea.hbm (!%p162_p10), %s659_s3, %s379_s10  ;;  %s286_s23 = sshll.u32 (!%p162_p10), %s188_s21, 4  ;;  %s287_s23 = int_to_ptr.vmem [resolvable:$true] %s286_s23 }
  0x12   : > { %s288_s26 = sshll.u32 (!%p162_p10), %s284_s19, 4  ;;  %s289_s26 = int_to_ptr.hbm [resolvable:$true] %s288_s26 }
  0x13   : > { %s459_s27 = sshra.s32 (!%p162_p10), %s289_s26, 4  ;;  %s460_s27 = int_to_ptr.hbm [resolvable:$true] %s459_s27 }
  0x14   : > { %v201_v0 = vld [vmem:[%s657_s1] sm:$0xff]  ;;  %v525_v1 = vmov 0   ;;  %v526_v2 = vmov 2   ;;  %v527_v4 = vmov 1   ;;  %v528_v5 = vmov 3   ;;  %s191_s30 = scalar_select %p190_p11, %s515_s15, 1 }
  0x15   : > { %439 = vset.pattern.permute.xlu0 %v525_v1  ;;  %441 = vset.pattern.permute.xlu1 %v526_v2  ;;  %v258_v3 = vld [vmem:[%s658_s2] sm:$0xff]  ;;  %s271_s15 = scalar_lea.sflag [#allocation3], %s186_s8  ;;  %s461_s28 = scalar_lea.hbm %s460_s27, 16 }
  0x16   : > { %204 = vperm.xlu0 %439, %v201_v0   ;;  %231 = vperm.xlu1 %441, %v201_v0   ;;  %s378_s4 = sshll.u32 %s191_s30, 3  ;;  %p462_p12 = scmp.ne.s32.totalorder %s460_s27, %s461_s28 }
  0x17   : > { %443 = vset.pattern.permute.xlu2 %v525_v1  ;;  %s197_s7 = scalar_lea.vmem %s656_s0, %s378_s4  ;;  %s465_s4 = scalar_lea.hbm %s659_s3, 32 }
  0x18   : > { %261 = vperm.xlu2 %443, %v258_v3   ;;  %v200_v6 = vld [vmem:[%s197_s7] sm:$0xff]  ;;  %p463_p13 = pnand %p462_p12, %p589_p4  ;;  %p466_p1 = scmp.lt.s32.totalorder %s460_s27, %s659_s3 }
  0x19   : > { %v208_v9 = vperm.slane %v200_v6, 0  ;;  %v209_v10 = vperm.slane %v200_v6, 4  ;;  %v220_v11 = vperm.slane %v200_v6, 1  ;;  %v221_v12 = vperm.slane %v200_v6, 5  ;;  %p467_p2 = scmp.lt.s32.totalorder %s465_s4, %s461_s28 }
  0x1a   : > { %v234_v13 = vperm.slane %v200_v6, 2  ;;  %v235_v14 = vperm.slane %v200_v6, 6  ;;  %v248_v15 = vperm.slane %v200_v6, 3  ;;  %v249_v16 = vperm.slane %v200_v6, 7  ;;  %p464_p0 = pneg %p463_p13 }
  0x1b   : > { %v212_v17 = vperm.slane %v208_v9, 0  ;;  %v213_v18 = vperm.slane %v209_v10, 0  ;;  %v224_v19 = vperm.slane %v220_v11, 1  ;;  %v225_v20 = vperm.slane %v221_v12, 1  ;;  %p468_p3 = por %p467_p2, %p466_p1 }
  0x1c   : > { %v238_v21 = vperm.slane %v234_v13, 2  ;;  %v239_v22 = vperm.slane %v235_v14, 2  ;;  %v252_v23 = vperm.slane %v248_v15, 3  ;;  %v253_v24 = vperm.slane %v249_v16, 3 }
  0x1d   : > { %p469_p5 = pnand %p468_p3, %p464_p0 }
  0x1e   : > { %440 = vset.pattern.permute.xlu0 %v527_v4  ;;  %442 = vset.pattern.permute.xlu1 %v528_v5 }
  0x1f   : > { %217 = vperm.xlu0 %440, %v201_v0   ;;  %245 = vperm.xlu1 %442, %v201_v0  }
  0x27   : > { %444 = vset.pattern.permute.xlu0 %v525_v1 }
  0x72   : > { %v262_v39 = vpop.permute.xlu2 %261 }
  0x88   : > { %v205_v7 = vpop.permute.xlu0 %204  ;;  %v232_v8 = vpop.permute.xlu1 %231 }
  0x89   : > { %v214_v27 = vmul.f32 %v212_v17, %v205_v7  ;;  %v215_v28 = vmul.f32 %v213_v18, %v205_v7  ;;  %v240_v31 = vmul.f32 %v238_v21, %v232_v8  ;;  %v241_v32 = vmul.f32 %v239_v22, %v232_v8 }
  0x91   : > { %v218_v25 = vpop.permute.xlu0 %217  ;;  %v246_v26 = vpop.permute.xlu1 %245 }
  0x92   : > { %v226_v29 = vmul.f32 %v224_v19, %v218_v25  ;;  %v227_v30 = vmul.f32 %v225_v20, %v218_v25  ;;  %v254_v35 = vmul.f32 %v252_v23, %v246_v26  ;;  %v255_v36 = vmul.f32 %v253_v24, %v246_v26 }
  0x94   : > { %v228_v33 = vadd.f32 %v226_v29, %v214_v27  ;;  %v229_v34 = vadd.f32 %v227_v30, %v215_v28 }
  0x96   : > { %v242_v37 = vadd.f32 %v240_v31, %v228_v33  ;;  %v243_v38 = vadd.f32 %v241_v32, %v229_v34 }
  0x98   : > { %v256_v40 = vadd.f32 %v254_v35, %v242_v37  ;;  %v257_v41 = vadd.f32 %v255_v36, %v243_v38 }
  0x9a   : > { %v264_v42 = vadd.f32 %v262_v39, %v256_v40  ;;  %v265_v43 = vadd.f32 %v262_v39, %v257_v41 }
  0x9c   : > { %v266_v44 = vmax.f32 %v264_v42, 0.0  ;;  %v267_v45 = vmax.f32 %v265_v43, 0.0 }
  0x9e   : > { %268 = vst [vmem:[%s188_s21] sm:$0xff] %v266_v44 }
  0x9f   : > { %269 = vst [vmem:[%s188_s21 + $0x8] sm:$0xff] %v267_v45 }
  0xa0   : > { %472 = shalt.err (!%p469_p5)
}
  0xa1   : > { %380 = dma.vmem_to_hbm [thread:$0]  (%p589_p4), %s287_s23, 256, %s289_s26, %s271_s15  }
  0xa2 PF: > { %p386_p6 = scmp.ge.s32.totalorder %s523_s17, 2  ;;  %s300_s7 = sand.u32 1, %s503_s12  }
  0xa3   : > { %s301_s8 = scalar_lea.sflag [#allocation3], %s300_s7 }
  0xa4   : > { %p383_p7 = pnand %p386_p6, %p596_p8 }
  0xa6   : > { %p384_p9 = pneg %p383_p7 }
  0xa8   : > { %498 = dma.done.wait (%p384_p9), %s301_s8, 256  }
  0xa9   : > { %500 = vsyncadd (%p384_p9), %s301_s8, 4294967040  ;;  %s16_s17 = sadd.s32 1, %s523_s17   ;;  %s662_s12 = smov %s507_s13 }
  0xaa   : > { %p13_p10 = scmp.ge.s32.totalorder %s16_s17, 4   ;;  %s663_s13 = smov %s511_s14 }
  0xab   : > { %s664_s14 = smov %s602_s25  ;;  %s665_s15 = smov %s519_s16 }
  0xac   : > { %s666_s16 = smov %s668_s20  ;;  %15 = sbr.rel (!%p13_p10) target bundleno = 4 (0x4), region = 67 }
  0xb1   :  { %307 = vsyncpa [#allocation3], 1 }
  0xb2   :  { %309 = vsyncpa [#allocation3 + $0x1], 1 }

</bundles_post_ra>
